<compile_context>
chip_gen: v6e
topology: v6e:2x2x1
jax: 0.10.0
libtpu: 0.0.40
codegen_flags: <defaults>
</compile_context>

<pallas_src>
import functools

import jax
import jax.numpy as jnp
import numpy as np
from jax import lax
from jax.experimental import pallas as pl
from jax.experimental.pallas import tpu as pltpu

LANE = 128


def _round_up(n, m):
    return ((n + m - 1) // m) * m


def _pad_to(x, shape):
    pads = [(0, t - s) for s, t in zip(x.shape, shape)]
    if all(p == (0, 0) for p in pads):
        return x
    return jnp.pad(x, pads)


# ------------------------------------------------------------------
# Fused kernel: all GCN blocks, both streams, one invocation.
# ------------------------------------------------------------------
def _em_gcn_fused_kernel(a_ref, x_ref, *refs, n_blocks, d_outs):
    w_refs = refs[:n_blocks]
    out_refs = refs[n_blocks:]

    a = a_ref[...]       # (N, N), loaded once, resident for the whole forward
    h1 = x_ref[...]      # stream 1 state (propagated with A)
    h2 = h1              # stream 2 state (propagated with A^T); same at block 0

    for i in range(n_blocks):
        w = w_refs[i][...]
        d = d_outs[i]
        last = i == n_blocks - 1

        # nn.Linear (bias=False): X @ W_t. Block 0 shares the product between
        # both streams (identical inputs) — computed once.
        xw1 = jnp.dot(h1, w, preferred_element_type=jnp.float32)
        xw2 = xw1 if i == 0 else jnp.dot(h2, w, preferred_element_type=jnp.float32)

        # Stream 1:  A @ (X W)    — contract A's column axis (NN).
        y1 = lax.dot_general(
            a, xw1,
            dimension_numbers=(((1,), (0,)), ((), ())),
            preferred_element_type=jnp.float32)
        # Stream 2:  A^T @ (X W)  — contract A's row axis (TN); the transpose
        # is never materialized, the same VMEM-resident tile is reused.
        y2 = lax.dot_general(
            a, xw2,
            dimension_numbers=(((0,), (0,)), ((), ())),
            preferred_element_type=jnp.float32)

        if not last:  # last GCN block has no activation (GCN('', ...))
            y1 = jnp.tanh(y1)
            y2 = jnp.tanh(y2)

        # Concatenated [stream1 | stream2] write straight from the kernel.
        out_refs[i][...] = jnp.concatenate(
            [y1[:, :d], y2[:, :d]], axis=1).astype(out_refs[i].dtype)

        h1, h2 = y1, y2


# ------------------------------------------------------------------
# EM_GCN.forward (direct mode) wrapper
# ------------------------------------------------------------------
def em_gcn_forward_direct(A_hat, emb_input, weights_t):
    """Mirrors EM_GCN.forward(A_hat, net) with direct=True, fully fused.

    weights_t: list of (D_in, D_out) matrices (transposed nn.Linear weights).
    Returns:   [emb_input, cat(out1_0, out2_0), cat(out1_1, out2_1), ...]
    """
    N = A_hat.shape[0]
    n_blocks = len(weights_t)
    d_in = emb_input.shape[1]
    d_outs = tuple(int(w.shape[1]) for w in weights_t)

    # --- one-time zero padding of the feature axes to 128-lane multiples ---
    d_in_p = _round_up(d_in, LANE)
    a = A_hat.astype(jnp.float32)
    x_p = _pad_to(emb_input.astype(jnp.float32), (N, d_in_p))
    w_p = []
    rows_p = d_in_p
    for w in weights_t:
        d_o_p = _round_up(w.shape[1], LANE)
        w_p.append(_pad_to(w.astype(jnp.float32), (rows_p, d_o_p)))
        rows_p = d_o_p

    # --- advisory cost estimate ---
    flops = 0
    for i, w in enumerate(w_p):
        di_p, do_p = w.shape
        n_xw = 1 if i == 0 else 2             # block-0 X@W is shared
        flops += n_xw * 2 * N * di_p * do_p   # linear
        flops += 2 * 2 * N * N * do_p         # A @ . and A^T @ .
    transcendentals = 2 * max(n_blocks - 1, 0) * N * w_p[0].shape[1]
    out_bytes = sum(N * 2 * d * 4 for d in d_outs)
    in_bytes = 4 * (a.size + x_p.size + sum(w.size for w in w_p))
    cost = pl.CostEstimate(flops=int(flops),
                           transcendentals=int(transcendentals),
                           bytes_accessed=int(in_bytes + out_bytes))

    # --- scoped VMEM: everything lives in VMEM for the fused forward ---
    vmem_needed = in_bytes + out_bytes + 4 * 4 * N * max(w.shape[1] for w in w_p)
    vmem_limit = int(min(max(2 * vmem_needed, 32 * 1024 * 1024),
                         64 * 1024 * 1024))   # keep under v7x physical VMEM

    kernel = functools.partial(_em_gcn_fused_kernel,
                               n_blocks=n_blocks, d_outs=d_outs)

    in_specs = ([pl.BlockSpec(a.shape, lambda i: (0, 0)),
                 pl.BlockSpec(x_p.shape, lambda i: (0, 0))] +
                [pl.BlockSpec(w.shape, lambda i: (0, 0)) for w in w_p])
    out_specs = tuple(pl.BlockSpec((N, 2 * d), lambda i: (0, 0)) for d in d_outs)
    out_shape = tuple(jax.ShapeDtypeStruct((N, 2 * d), jnp.float32)
                      for d in d_outs)

    block_outs = pl.pallas_call(
        kernel,
        out_shape=out_shape,
        grid=(1,),
        in_specs=in_specs,
        out_specs=out_specs,
        compiler_params=pltpu.CompilerParams(
            dimension_semantics=("arbitrary",),
            vmem_limit_bytes=vmem_limit),
        cost_estimate=cost,
    )(a, x_p, *w_p)

    return [emb_input] + list(block_outs)


# ------------------------------------------------------------------
# Pure-JAX reference of EM_GCN.forward_direct (for validation)
# ------------------------------------------------------------------
def _reference_forward_direct(A_hat, emb_input, weights_t):
    hp = jax.lax.Precision.HIGHEST
    outputs = [emb_input]
    h1 = h2 = emb_input
    At = A_hat.T
    n = len(weights_t)
    for i, w in enumerate(weights_t):
        y1 = jnp.dot(A_hat, jnp.dot(h1, w, precision=hp), precision=hp)
        y2 = jnp.dot(At, jnp.dot(h2, w, precision=hp), precision=hp)
        if i != n - 1:
            y1, y2 = jnp.tanh(y1), jnp.tanh(y2)
        outputs.append(jnp.concatenate([y1, y2], axis=1))
        h1, h2 = y1, y2
    return outputs


# ------------------------------------------------------------------
# Deterministic parameter init (xavier-uniform with tanh gain, like
# init_weight(..., 'tanh') in the reference repo)
# ------------------------------------------------------------------
def make_weights(key, input_dim, output_dim, num_blocks):
    weights_t = []
    d_in = input_dim
    gain = 5.0 / 3.0  # tanh gain
    for _ in range(num_blocks):
        key, sub = jax.random.split(key)
        limit = gain * jnp.sqrt(6.0 / (d_in + output_dim))
        w_t = jax.random.uniform(
            sub, (d_in, output_dim), jnp.float32, minval=-limit, maxval=limit)
        weights_t.append(w_t)
        d_in = output_dim
    return weights_t


if __name__ == "__main__":
    key = jax.random.PRNGKey(0)
    k_a, k_f, k_w = jax.random.split(key, 3)

    num_nodes = 64       # num_source_nodes
    input_dim = 32       # source_feats.shape[1]
    output_dim = 32
    num_gcn_blocks = 2

    # Dense stand-in for the sparse normalized Laplacian / adjacency matrix.
    A_hat = jax.random.uniform(k_a, (num_nodes, num_nodes), jnp.float32)
    A_hat = A_hat / jnp.sum(A_hat, axis=1, keepdims=True)  # row-normalize
    source_feats = jax.random.normal(k_f, (num_nodes, input_dim), jnp.float32)

    weights_t = make_weights(k_w, input_dim, output_dim, num_gcn_blocks)

    fwd = jax.jit(em_gcn_forward_direct)
    outputs = fwd(A_hat, source_feats, weights_t)
    outputs = jax.block_until_ready(outputs)

    # Shape checks: [ (N, D_in), (N, 2*D_out), (N, 2*D_out) ]
    assert outputs[0].shape == (num_nodes, input_dim)
    for o in outputs[1:]:
        assert o.shape == (num_nodes, 2 * output_dim)

    # Numerical check against a plain-JAX forward_direct reference.
    ref = _reference_forward_direct(A_hat, source_feats, weights_t)
    np.testing.assert_array_equal(np.asarray(outputs[0]), np.asarray(ref[0]))
    for got, want in zip(outputs[1:], ref[1:]):
        np.testing.assert_allclose(np.asarray(got), np.asarray(want),
                                   rtol=5e-3, atol=5e-3)

    print("KERNEL_OK")
</pallas_src>

<mosaic_0001>
module attributes {stable_mosaic.version = 11 : i64} {
  func.func @_em_gcn_fused_kernel(%arg0: i32, %arg1: memref<64x64xf32, #tpu.memory_space<vmem>>, %arg2: memref<64x128xf32, #tpu.memory_space<vmem>>, %arg3: memref<128x128xf32, #tpu.memory_space<vmem>>, %arg4: memref<128x128xf32, #tpu.memory_space<vmem>>, %arg5: memref<64x64xf32, #tpu.memory_space<vmem>>, %arg6: memref<64x64xf32, #tpu.memory_space<vmem>>) attributes {dimension_semantics = [#tpu.dimension_semantics<arbitrary>], iteration_bounds = array<i64: 1>, scalar_prefetch = 0 : i64, scratch_operands = 0 : i64, tpu.core_type = #tpu.core_type<tc>, window_params = [{pipeline_mode = #tpu.pipeline_mode<synchronous>, transform_indices = @transform_0, window_bounds = array<i64: 64, 64>}, {pipeline_mode = #tpu.pipeline_mode<synchronous>, transform_indices = @transform_1, window_bounds = array<i64: 64, 128>}, {pipeline_mode = #tpu.pipeline_mode<synchronous>, transform_indices = @transform_2, window_bounds = array<i64: 128, 128>}, {pipeline_mode = #tpu.pipeline_mode<synchronous>, transform_indices = @transform_3, window_bounds = array<i64: 128, 128>}, {pipeline_mode = #tpu.pipeline_mode<synchronous>, transform_indices = @transform_4, window_bounds = array<i64: 64, 64>}, {pipeline_mode = #tpu.pipeline_mode<synchronous>, transform_indices = @transform_5, window_bounds = array<i64: 64, 64>}]} {
    %c0 = arith.constant 0 : index
    %c0_0 = arith.constant 0 : index
    %0 = vector.load %arg1[%c0, %c0_0] : memref<64x64xf32, #tpu.memory_space<vmem>>, vector<64x64xf32>
    %c0_1 = arith.constant 0 : index
    %c0_2 = arith.constant 0 : index
    %1 = vector.load %arg2[%c0_1, %c0_2] : memref<64x128xf32, #tpu.memory_space<vmem>>, vector<64x128xf32>
    %c0_3 = arith.constant 0 : index
    %c0_4 = arith.constant 0 : index
    %2 = vector.load %arg3[%c0_3, %c0_4] : memref<128x128xf32, #tpu.memory_space<vmem>>, vector<128x128xf32>
    %cst = arith.constant dense<0.000000e+00> : vector<64x128xf32>
    %3 = tpu.matmul %1, %2, %cst {dimension_numbers = #tpu.dot_dimension_numbers<[1], [0], [0], [1], [0, 0, 1, 1], [], []>} : vector<64x128xf32>, vector<128x128xf32>, vector<64x128xf32> -> vector<64x128xf32>
    %cst_5 = arith.constant dense<0.000000e+00> : vector<64x128xf32>
    %4 = tpu.matmul %0, %3, %cst_5 {dimension_numbers = #tpu.dot_dimension_numbers<[1], [0], [0], [1], [0, 0, 1, 1], [], []>} : vector<64x64xf32>, vector<64x128xf32>, vector<64x128xf32> -> vector<64x128xf32>
    %cst_6 = arith.constant dense<0.000000e+00> : vector<64x128xf32>
    %5 = tpu.matmul %0, %3, %cst_6 {dimension_numbers = #tpu.dot_dimension_numbers<[0], [0], [1], [1], [0, 1, 1, 1], [], []>} : vector<64x64xf32>, vector<64x128xf32>, vector<64x128xf32> -> vector<64x128xf32>
    %6 = math.tanh %4 : vector<64x128xf32>
    %7 = math.tanh %5 : vector<64x128xf32>
    %8 = vector.extract_strided_slice %6 {offsets = [0, 0], sizes = [64, 32], strides = [1, 1]} : vector<64x128xf32> to vector<64x32xf32>
    %9 = vector.extract_strided_slice %7 {offsets = [0, 0], sizes = [64, 32], strides = [1, 1]} : vector<64x128xf32> to vector<64x32xf32>
    %10 = tpu.concatenate %8, %9 in 1 : vector<64x32xf32>, vector<64x32xf32> -> vector<64x64xf32>
    %c0_7 = arith.constant 0 : index
    %c0_8 = arith.constant 0 : index
    %11 = vector.load %arg5[%c0_7, %c0_8] : memref<64x64xf32, #tpu.memory_space<vmem>>, vector<64x64xf32>
    tpu.vector_store %arg5[%c0_7, %c0_8], %10 {strides = array<i32>} : memref<64x64xf32, #tpu.memory_space<vmem>>, vector<64x64xf32>,
    %c0_9 = arith.constant 0 : index
    %c0_10 = arith.constant 0 : index
    %12 = vector.load %arg4[%c0_9, %c0_10] : memref<128x128xf32, #tpu.memory_space<vmem>>, vector<128x128xf32>
    %cst_11 = arith.constant dense<0.000000e+00> : vector<64x128xf32>
    %13 = tpu.matmul %6, %12, %cst_11 {dimension_numbers = #tpu.dot_dimension_numbers<[1], [0], [0], [1], [0, 0, 1, 1], [], []>} : vector<64x128xf32>, vector<128x128xf32>, vector<64x128xf32> -> vector<64x128xf32>
    %cst_12 = arith.constant dense<0.000000e+00> : vector<64x128xf32>
    %14 = tpu.matmul %7, %12, %cst_12 {dimension_numbers = #tpu.dot_dimension_numbers<[1], [0], [0], [1], [0, 0, 1, 1], [], []>} : vector<64x128xf32>, vector<128x128xf32>, vector<64x128xf32> -> vector<64x128xf32>
    %cst_13 = arith.constant dense<0.000000e+00> : vector<64x128xf32>
    %15 = tpu.matmul %0, %13, %cst_13 {dimension_numbers = #tpu.dot_dimension_numbers<[1], [0], [0], [1], [0, 0, 1, 1], [], []>} : vector<64x64xf32>, vector<64x128xf32>, vector<64x128xf32> -> vector<64x128xf32>
    %cst_14 = arith.constant dense<0.000000e+00> : vector<64x128xf32>
    %16 = tpu.matmul %0, %14, %cst_14 {dimension_numbers = #tpu.dot_dimension_numbers<[0], [0], [1], [1], [0, 1, 1, 1], [], []>} : vector<64x64xf32>, vector<64x128xf32>, vector<64x128xf32> -> vector<64x128xf32>
    %17 = vector.extract_strided_slice %15 {offsets = [0, 0], sizes = [64, 32], strides = [1, 1]} : vector<64x128xf32> to vector<64x32xf32>
    %18 = vector.extract_strided_slice %16 {offsets = [0, 0], sizes = [64, 32], strides = [1, 1]} : vector<64x128xf32> to vector<64x32xf32>
    %19 = tpu.concatenate %17, %18 in 1 : vector<64x32xf32>, vector<64x32xf32> -> vector<64x64xf32>
    %c0_15 = arith.constant 0 : index
    %c0_16 = arith.constant 0 : index
    %20 = vector.load %arg6[%c0_15, %c0_16] : memref<64x64xf32, #tpu.memory_space<vmem>>, vector<64x64xf32>
    tpu.vector_store %arg6[%c0_15, %c0_16], %19 {strides = array<i32>} : memref<64x64xf32, #tpu.memory_space<vmem>>, vector<64x64xf32>,
    return
  }
  func.func @transform_0(%arg0: i32) -> (i32, i32) {
    %c0_i32 = arith.constant 0 : i32
    %c0_i32_0 = arith.constant 0 : i32
    %c0_i32_1 = arith.constant 0 : i32
    return %c0_i32, %c0_i32_0 : i32, i32
  }
  func.func @transform_1(%arg0: i32) -> (i32, i32) {
    %c0_i32 = arith.constant 0 : i32
    %c0_i32_0 = arith.constant 0 : i32
    %c0_i32_1 = arith.constant 0 : i32
    return %c0_i32, %c0_i32_0 : i32, i32
  }
  func.func @transform_2(%arg0: i32) -> (i32, i32) {
    %c0_i32 = arith.constant 0 : i32
    %c0_i32_0 = arith.constant 0 : i32
    %c0_i32_1 = arith.constant 0 : i32
    return %c0_i32, %c0_i32_0 : i32, i32
  }
  func.func @transform_3(%arg0: i32) -> (i32, i32) {
    %c0_i32 = arith.constant 0 : i32
    %c0_i32_0 = arith.constant 0 : i32
    %c0_i32_1 = arith.constant 0 : i32
    return %c0_i32, %c0_i32_0 : i32, i32
  }
  func.func @transform_4(%arg0: i32) -> (i32, i32) {
    %c0_i32 = arith.constant 0 : i32
    %c0_i32_0 = arith.constant 0 : i32
    %c0_i32_1 = arith.constant 0 : i32
    return %c0_i32, %c0_i32_0 : i32, i32
  }
  func.func @transform_5(%arg0: i32) -> (i32, i32) {
    %c0_i32 = arith.constant 0 : i32
    %c0_i32_0 = arith.constant 0 : i32
    %c0_i32_1 = arith.constant 0 : i32
    return %c0_i32, %c0_i32_0 : i32, i32
  }
}

</mosaic_0001>

<bundles_post_ra>
// kernel: em_gcn_forward_direct.1
= control target key start
LH: loop header
LB: loop body
LE: loop exit
PB: predicated region body
PF: predicated region fallthrough
CT: control target
= control target key end

     0   :  { %11 = vsyncpa [#allocation3], 0  ;;  %s1917_s0 = inlined_call_operand.vmem [shape: f32[64,64], index: 0, kind: input, shape index: {}]   ;;  %s1918_s1 = inlined_call_operand.vmem [shape: f32[64,128], index: 1, kind: input, shape index: {}]   ;;  %s1919_s2 = inlined_call_operand.vmem [shape: f32[128,128], index: 2, kind: input, shape index: {}]   ;;  %s1920_s3 = inlined_call_operand.vmem [shape: f32[128,128], index: 3, kind: input, shape index: {}]   ;;  %s1921_s4 = inlined_call_operand.hbm [shape: f32[64,64], index: 4, kind: output, shape index: {0}]   ;;  %s1922_s5 = inlined_call_operand.hbm [shape: f32[64,64], index: 5, kind: output, shape index: {1}]  }
   0x1   :  { %v52_v0 = vld [vmem:[%s1919_s2 + $0x78] sm:$0xff]  ;;  %v51_v1 = vld [vmem:[%s1919_s2 + $0x70] sm:$0xff]  ;;  %v50_v2 = vld [vmem:[%s1919_s2 + $0x68] sm:$0xff] }
   0x2   :  { %1198 = vmatprep.subr.mxu0 %v52_v0  ;;  %v49_v3 = vld [vmem:[%s1919_s2 + $0x60] sm:$0xff]  ;;  %v48_v5 = vld [vmem:[%s1919_s2 + $0x58] sm:$0xff]  ;;  %v47_v6 = vld [vmem:[%s1919_s2 + $0x50] sm:$0xff] }
   0x3   :  { %1199 = vmatpush3.msra.mxu0 %v52_v0  ;;  %v29_v4 = vld [vmem:[%s1918_s1] sm:$0xff]  ;;  %v46_v8 = vld [vmem:[%s1919_s2 + $0x48] sm:$0xff] }
   0x4   :  { %1200 = vmatprep.subr.mxu0 %v51_v1  ;;  %1230 = vmatprep.mubr.f32.mxu0 %v29_v4  ;;  %v1583_v7 = vld [vmem:[%s1917_s0] sm:$0xff]  ;;  %v1592_v9 = vld [vmem:[%s1917_s0 + $0x8] sm:$0xff] }
   0x5   :  { %1201 = vmatpush3.msra.mxu0 %v51_v1  ;;  %288 = vxpose.xlu0.b32.start [1/8] (short) (narrow) %v1583_v7, 64 }
   0x6   :  { %1202 = vmatprep.subr.mxu0 %v50_v2 }
   0x7   :  { %1203 = vmatpush3.msra.mxu0 %v50_v2 }
   0x8   :  { %1204 = vmatprep.subr.mxu0 %v49_v3 }
   0x9   :  { %1205 = vmatpush3.msra.mxu0 %v49_v3 }
   0xa   :  { %1206 = vmatprep.subr.mxu0 %v48_v5 }
   0xb   :  { %1207 = vmatpush3.msra.mxu0 %v48_v5 }
   0xc   :  { %12 = vsyncpa [#allocation5], 0  ;;  %1208 = vmatprep.subr.mxu0 %v47_v6  ;;  %v45_v10 = vld [vmem:[%s1919_s2 + $0x40] sm:$0xff]  ;;  %289 = vxpose.xlu0.b32.cont [2/8] (short) (narrow) %v1592_v9, 64  ;;  %v44_v11 = vld [vmem:[%s1919_s2 + $0x38] sm:$0xff]  ;;  %vm158_vm0 = vcmask 523264  }
   0xd   :  { %1209 = vmatpush3.msra.mxu0 %v47_v6  ;;  %v1604_v12 = vld [vmem:[%s1917_s0 + $0x10] sm:$0xff]  ;;  %v42_v14 = vld [vmem:[%s1919_s2 + $0x28] sm:$0xff]  ;;  %v1616_v15 = vld [vmem:[%s1917_s0 + $0x18] sm:$0xff]  ;;  %1258 = vmatprep.mubr.msk.f32.mxu1 %vm158_vm0, %v1583_v7  ;;  %vm497_vm1 = vcmask 261120  }
   0xe   :  { %1210 = vmatprep.subr.mxu0 %v46_v8  ;;  %v43_v13 = vld [vmem:[%s1919_s2 + $0x30] sm:$0xff]  ;;  %v41_v16 = vld [vmem:[%s1919_s2 + $0x20] sm:$0xff]  ;;  %v40_v17 = vld [vmem:[%s1919_s2 + $0x18] sm:$0xff] }
   0xf   :  { %1211 = vmatpush3.msra.mxu0 %v46_v8  ;;  %v1628_v18 = vld [vmem:[%s1917_s0 + $0x20] sm:$0xff]  ;;  %v39_v19 = vld [vmem:[%s1919_s2 + $0x10] sm:$0xff]  ;;  %v38_v20 = vld [vmem:[%s1919_s2 + $0x8] sm:$0xff] }
  0x10   :  { %1212 = vmatprep.subr.mxu0 %v45_v10  ;;  %290 = vxpose.xlu0.b32.cont [3/8] (short) (narrow) %v1604_v12, 64  ;;  %v1640_v21 = vld [vmem:[%s1917_s0 + $0x28] sm:$0xff]  ;;  %v37_v22 = vld [vmem:[%s1919_s2] sm:$0xff]  ;;  %v1652_v24 = vld [vmem:[%s1917_s0 + $0x30] sm:$0xff] }
  0x11   :  { %1213 = vmatpush3.msra.mxu0 %v45_v10  ;;  %v30_v23 = vld [vmem:[%s1918_s1 + $0x8] sm:$0xff]  ;;  %v31_v25 = vld [vmem:[%s1918_s1 + $0x10] sm:$0xff]  ;;  %v32_v26 = vld [vmem:[%s1918_s1 + $0x18] sm:$0xff] }
  0x12   :  { %1214 = vmatprep.subr.mxu0 %v44_v11  ;;  %v1664_v27 = vld [vmem:[%s1917_s0 + $0x38] sm:$0xff]  ;;  %v33_v28 = vld [vmem:[%s1918_s1 + $0x20] sm:$0xff]  ;;  %v34_v29 = vld [vmem:[%s1918_s1 + $0x28] sm:$0xff] }
  0x13   :  { %1215 = vmatpush3.msra.mxu0 %v44_v11  ;;  %v35_v30 = vld [vmem:[%s1918_s1 + $0x30] sm:$0xff]  ;;  %v36_v31 = vld [vmem:[%s1918_s1 + $0x38] sm:$0xff]  ;;  %v1696_v34 = vld [vmem:[%s1920_s3 + $0x68] sm:$0xff]  ;;  %s1525_s1 = smov [#allocation2]  }
  0x14   :  { %1216 = vmatprep.subr.mxu0 %v43_v13  ;;  %291 = vxpose.xlu0.b32.cont [4/8] (short) (narrow) %v1616_v15, 64  ;;  %v1684_v32 = vld [vmem:[%s1920_s3 + $0x78] sm:$0xff]  ;;  %v1689_v33 = vld [vmem:[%s1920_s3 + $0x70] sm:$0xff]  ;;  %v1703_v35 = vld [vmem:[%s1920_s3 + $0x60] sm:$0xff]  ;;  %s1003_s9 = sshll.u32 %s1525_s1, 4  ;;  %s1004_s9 = int_to_ptr.vmem [resolvable:$true] %s1003_s9 }
  0x15   :  { %1217 = vmatpush3.msra.mxu0 %v43_v13  ;;  %v1710_v36 = vld [vmem:[%s1920_s3 + $0x58] sm:$0xff]  ;;  %v1717_v37 = vld [vmem:[%s1920_s3 + $0x50] sm:$0xff]  ;;  %v1724_v38 = vld [vmem:[%s1920_s3 + $0x48] sm:$0xff]  ;;  %s1480_s10 = scalar_lea.vmem %s1004_s9, 1024  ;;  %p1485_p1 = scmp.lt.s32.totalorder %s1004_s9, %s1004_s9 }
  0x16   :  { %1218 = vmatprep.subr.mxu0 %v42_v14  ;;  %v522_v55 = vld [vmem:[%s1920_s3 + $0x40] sm:$0xff]  ;;  %v521_v56 = vld [vmem:[%s1920_s3 + $0x38] sm:$0xff]  ;;  %v520_v57 = vld [vmem:[%s1920_s3 + $0x30] sm:$0xff]  ;;  %p1481_p0 = scmp.ne.s32.totalorder %s1004_s9, %s1480_s10  ;;  %p1486_p2 = scmp.lt.s32.totalorder %s1480_s10, %s1480_s10 }
  0x17   :  { %1219 = vmatpush3.msra.mxu0 %v42_v14  ;;  %v519_v58 = vld [vmem:[%s1920_s3 + $0x28] sm:$0xff]  ;;  %v518_v59 = vld [vmem:[%s1920_s3 + $0x20] sm:$0xff]  ;;  %v517_v60 = vld [vmem:[%s1920_s3 + $0x18] sm:$0xff] }
  0x18   :  { %1220 = vmatprep.subr.mxu0 %v41_v16  ;;  %292 = vxpose.xlu0.b32.cont [5/8] (short) (narrow) %v1628_v18, 64  ;;  %v516_v61 = vld [vmem:[%s1920_s3 + $0x10] sm:$0xff]  ;;  %v515_v62 = vld [vmem:[%s1920_s3 + $0x8] sm:$0xff]  ;;  %v514_v63 = vld [vmem:[%s1920_s3] sm:$0xff]  ;;  %s1524_s3 = smov 32   ;;  %p1487_p3 = por %p1486_p2, %p1485_p1 }
  0x19   :  { %1221 = vmatpush3.msra.mxu0 %v41_v16 }
  0x1a   :  { %1222 = vmatprep.subr.mxu0 %v40_v17  ;;  %p1488_p4 = pnand %p1487_p3, %p1481_p0 }
  0x1b   :  { %1223 = vmatpush3.msra.mxu0 %v40_v17 }
  0x1c   :  { %1224 = vmatprep.subr.mxu0 %v39_v19  ;;  %293 = vxpose.xlu0.b32.cont [6/8] (short) (narrow) %v1640_v21, 64 }
  0x1d   :  { %1225 = vmatpush3.msra.mxu0 %v39_v19 }
  0x1e   :  { %1226 = vmatprep.subr.mxu0 %v38_v20 }
  0x1f   :  { %1227 = vmatpush3.msra.mxu0 %v38_v20 }
  0x20   :  { %1228 = vmatprep.subr.mxu0 %v37_v22  ;;  %294 = vxpose.xlu0.b32.cont [7/8] (short) (narrow) %v1652_v24, 64 }
  0x21   :  { %1229 = vmatpush3.msra.mxu0 %v37_v22 }
  0x22   :  { %1231 = vmatmul.mubr.f32.vlgmr.msra.gmra.mxu0 %v30_v23  ;;  %1298 = vmatprep.subr.mxu0 %v1684_v32 }
  0x23   :  { %1233 = vmatprep.mubr.f32.mxu0 %v31_v25  ;;  %1299 = vmatpush3.msra.mxu0 %v1684_v32 }
  0x24   :  { %295 = vxpose.xlu0.b32.end [8/8] (short) (narrow) %v1664_v27, 64  ;;  %1300 = vmatprep.subr.mxu0 %v1689_v33 }
  0x25   :  { %1301 = vmatpush3.msra.mxu0 %v1689_v33 }
  0x26   :  { %1234 = vmatmul.mubr.f32.gmra.mxu0 %v32_v26  ;;  %1302 = vmatprep.subr.mxu0 %v1696_v34 }
  0x27   :  { %1236 = vmatprep.mubr.f32.mxu0 %v33_v28  ;;  %1303 = vmatpush3.msra.mxu0 %v1696_v34 }
  0x28   :  { %1304 = vmatprep.subr.mxu0 %v1703_v35 }
  0x29   :  { %1305 = vmatpush3.msra.mxu0 %v1703_v35 }
  0x2a   :  { %1237 = vmatmul.mubr.f32.gmra.mxu0 %v34_v29  ;;  %1306 = vmatprep.subr.mxu0 %v1710_v36 }
  0x2b   :  { %1239 = vmatprep.mubr.f32.mxu0 %v35_v30  ;;  %1307 = vmatpush3.msra.mxu0 %v1710_v36 }
  0x2c   :  { %1308 = vmatprep.subr.mxu0 %v1717_v37 }
  0x2d   :  { %1309 = vmatpush3.msra.mxu0 %v1717_v37 }
  0x2e   :  { %1240 = vmatmul.mubr.f32.gmra.mxu0 %v36_v31  ;;  %1310 = vmatprep.subr.mxu0 %v1724_v38 }
  0x2f   :  { %1311 = vmatpush3.msra.mxu0 %v1724_v38 }
  0x30   :  { %1312 = vmatprep.subr.mxu0 %v522_v55 }
  0x31   :  { %1313 = vmatpush3.msra.mxu0 %v522_v55 }
  0x32   :  { %1314 = vmatprep.subr.mxu0 %v521_v56 }
  0x33   :  { %1315 = vmatpush3.msra.mxu0 %v521_v56 }
  0x34   :  { %1316 = vmatprep.subr.mxu0 %v520_v57 }
  0x35   :  { %1317 = vmatpush3.msra.mxu0 %v520_v57 }
  0x36   :  { %1318 = vmatprep.subr.mxu0 %v519_v58 }
  0x37   :  { %1319 = vmatpush3.msra.mxu0 %v519_v58 }
  0x38   :  { %1320 = vmatprep.subr.mxu0 %v518_v59 }
  0x39   :  { %1321 = vmatpush3.msra.mxu0 %v518_v59 }
  0x3a   :  { %1322 = vmatprep.subr.mxu0 %v517_v60 }
  0x3b   :  { %1323 = vmatpush3.msra.mxu0 %v517_v60 }
  0x3c   :  { %1324 = vmatprep.subr.mxu0 %v516_v61 }
  0x3d   :  { %1325 = vmatpush3.msra.mxu0 %v516_v61 }
  0x3e   :  { %1326 = vmatprep.subr.mxu0 %v515_v62 }
  0x3f   :  { %1327 = vmatpush3.msra.mxu0 %v515_v62 }
  0x40   :  { %1328 = vmatprep.subr.mxu0 %v514_v63 }
  0x41   :  { %1329 = vmatpush3.msra.mxu0 %v514_v63 }
  0x84   :  { %v1730_v46 = vpop.trf.xlu0 }
  0x88   :  { %v1732_v48 = vpop.trf.xlu0 }
  0x8c   :  { %v1734_v49 = vpop.trf.xlu0 }
  0x90   :  { %v1740_v50 = vpop.trf.xlu0 }
  0x94   :  { %v1746_v51 = vpop.trf.xlu0 }
  0x98   :  { %v1756_v52 = vpop.trf.xlu0 }
  0x9c   :  { %v1765_v53 = vpop.trf.xlu0 }
  0xa0   :  { %v1781_v54 = vpop.trf.xlu0 }
  0xe2   :  { %v1232_v39 = vpop.f32.mrf.mxu0 }
  0xe4   :  { %v119_v40 = vpop.f32.mrf.mxu0 }
  0xe6   :  { %v1235_v41 = vpop.f32.mrf.mxu0 }
  0xe8   :  { %v129_v42 = vpop.f32.mrf.mxu0 }
  0xea   :  { %v1238_v43 = vpop.f32.mrf.mxu0 }
  0xec   :  { %v139_v44 = vpop.f32.mrf.mxu0 }
  0xee   :  { %v1241_v45 = vpop.f32.mrf.mxu0 }
  0xef   :  { %1242 = vmatprep.subr.mxu1 %v1241_v45 }
  0xf0   :  { %v149_v47 = vpop.f32.mrf.mxu0  ;;  %1243 = vmatpush3.msra.mxu1 %v1241_v45 }
  0xf1   :  { %1244 = vmatprep.subr.mxu1 %v149_v47 }
  0xf2   :  { %1245 = vmatpush3.msra.mxu1 %v149_v47 }
  0xf3   :  { %1246 = vmatprep.subr.mxu1 %v1238_v43 }
  0xf4   :  { %1247 = vmatpush3.msra.mxu1 %v1238_v43 }
  0xf5   :  { %1248 = vmatprep.subr.mxu1 %v139_v44 }
  0xf6   :  { %1249 = vmatpush3.msra.mxu1 %v139_v44 }
  0xf7   :  { %1250 = vmatprep.subr.mxu1 %v1235_v41 }
  0xf8   :  { %1251 = vmatpush3.msra.mxu1 %v1235_v41 }
  0xf9   :  { %1252 = vmatprep.subr.mxu1 %v129_v42 }
  0xfa   :  { %1253 = vmatpush3.msra.mxu1 %v129_v42 }
  0xfb   :  { %1254 = vmatprep.subr.mxu1 %v1232_v39 }
  0xfc   :  { %1255 = vmatpush3.msra.mxu1 %v1232_v39 }
  0xfd   :  { %1256 = vmatprep.subr.mxu1 %v119_v40 }
  0xfe   :  { %1257 = vmatpush3.msra.mxu1 %v119_v40 }
  0xff   :  { %1259 = vmatmul.mubr.msk.f32.vlgmr.msra.gmra.mxu1 %vm158_vm0, %v1592_v9  ;;  %1270 = vmatprep.subr.mxu1 %v1241_v45 }
 0x100   :  { %1271 = vmatpush3.msra.mxu1 %v1241_v45  ;;  %1261 = vmatprep.mubr.msk.f32.mxu1 %vm158_vm0, %v1604_v12 }
 0x101   :  { %1272 = vmatprep.subr.mxu1 %v149_v47 }
 0x102   :  { %1273 = vmatpush3.msra.mxu1 %v149_v47 }
 0x103   :  { %1262 = vmatmul.mubr.msk.f32.gmra.mxu1 %vm158_vm0, %v1616_v15  ;;  %1274 = vmatprep.subr.mxu1 %v1238_v43 }
 0x104   :  { %1275 = vmatpush3.msra.mxu1 %v1238_v43  ;;  %1264 = vmatprep.mubr.msk.f32.mxu1 %vm158_vm0, %v1628_v18 }
 0x105   :  { %1276 = vmatprep.subr.mxu1 %v139_v44 }
 0x106   :  { %1277 = vmatpush3.msra.mxu1 %v139_v44 }
 0x107   :  { %1265 = vmatmul.mubr.msk.f32.gmra.mxu1 %vm158_vm0, %v1640_v21  ;;  %1278 = vmatprep.subr.mxu1 %v1235_v41 }
 0x108   :  { %1279 = vmatpush3.msra.mxu1 %v1235_v41  ;;  %1267 = vmatprep.mubr.msk.f32.mxu1 %vm158_vm0, %v1652_v24 }
 0x109   :  { %1280 = vmatprep.subr.mxu1 %v129_v42 }
 0x10a   :  { %1281 = vmatpush3.msra.mxu1 %v129_v42 }
 0x10b   :  { %1268 = vmatmul.mubr.msk.f32.gmra.mxu1 %vm158_vm0, %v1664_v27  ;;  %1282 = vmatprep.subr.mxu1 %v1232_v39 }
 0x10c   :  { %1283 = vmatpush3.msra.mxu1 %v1232_v39  ;;  %1286 = vmatprep.mubr.msk.f32.mxu1 %vm158_vm0, %v1730_v46 }
 0x10d   :  { %1284 = vmatprep.subr.mxu1 %v119_v40 }
 0x10e   :  { %1285 = vmatpush3.msra.mxu1 %v119_v40 }
 0x10f   :  { %1287 = vmatmul.mubr.msk.f32.vlgmr.msra.gmra.mxu1 %vm158_vm0, %v1732_v48  ;;  %1342 = vmatprep.subr.mxu1 %v1684_v32 }
 0x110   :  { %1289 = vmatprep.mubr.msk.f32.mxu1 %vm158_vm0, %v1734_v49  ;;  %1343 = vmatpush3.msra.mxu1 %v1684_v32 }
 0x111   :  { %1344 = vmatprep.subr.mxu1 %v1689_v33 }
 0x112   :  { %1345 = vmatpush3.msra.mxu1 %v1689_v33 }
 0x113   :  { %1290 = vmatmul.mubr.msk.f32.gmra.mxu1 %vm158_vm0, %v1740_v50  ;;  %1346 = vmatprep.subr.mxu1 %v1696_v34 }
 0x114   :  { %1292 = vmatprep.mubr.msk.f32.mxu1 %vm158_vm0, %v1746_v51  ;;  %1347 = vmatpush3.msra.mxu1 %v1696_v34 }
 0x115   :  { %1348 = vmatprep.subr.mxu1 %v1703_v35 }
 0x116   :  { %1349 = vmatpush3.msra.mxu1 %v1703_v35 }
 0x117   :  { %1293 = vmatmul.mubr.msk.f32.gmra.mxu1 %vm158_vm0, %v1756_v52  ;;  %1350 = vmatprep.subr.mxu1 %v1710_v36 }
 0x118   :  { %1295 = vmatprep.mubr.msk.f32.mxu1 %vm158_vm0, %v1765_v53  ;;  %1351 = vmatpush3.msra.mxu1 %v1710_v36 }
 0x119   :  { %1352 = vmatprep.subr.mxu1 %v1717_v37 }
 0x11a   :  { %1353 = vmatpush3.msra.mxu1 %v1717_v37 }
 0x11b   :  { %1296 = vmatmul.mubr.msk.f32.gmra.mxu1 %vm158_vm0, %v1781_v54  ;;  %1354 = vmatprep.subr.mxu1 %v1724_v38 }
 0x11c   :  { %1355 = vmatpush3.msra.mxu1 %v1724_v38 }
 0x11d   :  { %1356 = vmatprep.subr.mxu1 %v522_v55 }
 0x11e   :  { %1357 = vmatpush3.msra.mxu1 %v522_v55 }
 0x11f   :  { %1358 = vmatprep.subr.mxu1 %v521_v56 }
 0x120   :  { %1359 = vmatpush3.msra.mxu1 %v521_v56 }
 0x121   :  { %1360 = vmatprep.subr.mxu1 %v520_v57 }
 0x122   :  { %1361 = vmatpush3.msra.mxu1 %v520_v57 }
 0x123   :  { %1362 = vmatprep.subr.mxu1 %v519_v58 }
 0x124   :  { %1363 = vmatpush3.msra.mxu1 %v519_v58 }
 0x125   :  { %1364 = vmatprep.subr.mxu1 %v518_v59 }
 0x126   :  { %1365 = vmatpush3.msra.mxu1 %v518_v59 }
 0x127   :  { %1366 = vmatprep.subr.mxu1 %v517_v60 }
 0x128   :  { %1367 = vmatpush3.msra.mxu1 %v517_v60 }
 0x129   :  { %1368 = vmatprep.subr.mxu1 %v516_v61 }
 0x12a   :  { %1369 = vmatpush3.msra.mxu1 %v516_v61 }
 0x12b   :  { %1370 = vmatprep.subr.mxu1 %v515_v62 }
 0x12c   :  { %1371 = vmatpush3.msra.mxu1 %v515_v62 }
 0x12d   :  { %1372 = vmatprep.subr.mxu1 %v514_v63 }
 0x12e   :  { %1373 = vmatpush3.msra.mxu1 %v514_v63 }
 0x1bf   :  { %v1260_v0 = vpop.f32.mrf.mxu1 }
 0x1c1   :  { %v249_v1 = vpop.f32.mrf.mxu1 }
 0x1c2   :  { %1448 = vtanh.f32 %v249_v1 }
 0x1c3   :  { %1450 = vtanh.f32 %v1260_v0  ;;  %v1263_v2 = vpop.f32.mrf.mxu1 }
 0x1c5   :  { %v259_v3 = vpop.f32.mrf.mxu1 }
 0x1c6   :  { %1452 = vtanh.f32 %v259_v3 }
 0x1c7   :  { %1454 = vtanh.f32 %v1263_v2  ;;  %v1266_v4 = vpop.f32.mrf.mxu1 }
 0x1c9   :  { %v269_v5 = vpop.f32.mrf.mxu1 }
 0x1ca   :  { %1456 = vtanh.f32 %v269_v5 }
 0x1cb   :  { %1458 = vtanh.f32 %v1266_v4  ;;  %v1269_v6 = vpop.f32.mrf.mxu1 }
 0x1cd   :  { %v279_v8 = vpop.f32.mrf.mxu1 }
 0x1ce   :  { %1460 = vtanh.f32 %v279_v8 }
 0x1cf   :  { %v1817_v10 = vpop.eup %1448  ;;  %1462 = vtanh.f32 %v1269_v6  ;;  %v1288_v11 = vpop.f32.mrf.mxu1 }
 0x1d0   :  { %v1451_v13 = vpop.eup %1450  ;;  %1464 = vtanh.f32 %v1288_v11  ;;  %1330 = vmatprep.mubr.f32.mxu0 %v1817_v10 }
 0x1d1   :  { %v410_v14 = vpop.f32.mrf.mxu1  ;;  %1331 = vmatmul.mubr.f32.vlgmr.msra.gmra.mxu0 %v1451_v13 }
 0x1d2   :  { %1466 = vtanh.f32 %v410_v14 }
 0x1d3   :  { %v1820_v16 = vpop.eup %1452  ;;  %v1291_v17 = vpop.f32.mrf.mxu1 }
 0x1d4   :  { %v1455_v19 = vpop.eup %1454  ;;  %1333 = vmatprep.mubr.f32.mxu0 %v1820_v16 }
 0x1d5   :  { %v420_v20 = vpop.f32.mrf.mxu1  ;;  %1334 = vmatmul.mubr.f32.gmra.mxu0 %v1455_v19 }
 0x1d6   :  { %1468 = vtanh.f32 %v420_v20 }
 0x1d7   :  { %v1457_v22 = vpop.eup %1456  ;;  %1470 = vtanh.f32 %v1291_v17  ;;  %v1294_v23 = vpop.f32.mrf.mxu1 }
 0x1d8   :  { %v1459_v25 = vpop.eup %1458  ;;  %1336 = vmatprep.mubr.f32.mxu0 %v1457_v22 }
 0x1d9   :  { %v430_v26 = vpop.f32.mrf.mxu1  ;;  %1337 = vmatmul.mubr.f32.gmra.mxu0 %v1459_v25 }
 0x1da   :  { %1472 = vtanh.f32 %v430_v26 }
 0x1db   :  { %v1461_v28 = vpop.eup %1460  ;;  %1474 = vtanh.f32 %v1294_v23  ;;  %v1297_v29 = vpop.f32.mrf.mxu1 }
 0x1dc   :  { %v1463_v30 = vpop.eup %1462  ;;  %1339 = vmatprep.mubr.f32.mxu0 %v1461_v28 }
 0x1dd   :  { %v1465_v31 = vpop.eup %1464  ;;  %v440_v32 = vpop.f32.mrf.mxu1  ;;  %1340 = vmatmul.mubr.f32.gmra.mxu0 %v1463_v30 }
 0x1de   :  { %1476 = vtanh.f32 %v440_v32  ;;  %475 = vrot.lane.b32.xlu1 %v1465_v31, %s1524_s3  ;;  %1402 = vmatprep.mubr.msk.f32.mxu0 %vm158_vm0, %v1583_v7 }
 0x1df   :  { %v1467_v33 = vpop.eup %1466  ;;  %1478 = vtanh.f32 %v1297_v29 }
 0x1e0   :  { %1374 = vmatprep.mubr.f32.mxu1 %v1467_v33 }
 0x1e1   :  { %1375 = vmatmul.mubr.f32.vlgmr.msra.gmra.mxu1 %v1465_v31 }
 0x1e2   :  { %473 = vrot.lane.b32.xlu1 %v1467_v33, %s1524_s3 }
 0x1e3   :  { %v1469_v34 = vpop.eup %1468 }
 0x1e4   :  { %v1471_v35 = vpop.eup %1470  ;;  %1377 = vmatprep.mubr.f32.mxu1 %v1469_v34 }
 0x1e5   :  { %1378 = vmatmul.mubr.f32.gmra.mxu1 %v1471_v35 }
 0x1e6   :  { %479 = vrot.lane.b32.xlu1 %v1471_v35, %s1524_s3 }
 0x1e7   :  { %v1473_v36 = vpop.eup %1472 }
 0x1e8   :  { %v1475_v37 = vpop.eup %1474  ;;  %1380 = vmatprep.mubr.f32.mxu1 %v1473_v36 }
 0x1e9   :  { %1381 = vmatmul.mubr.f32.gmra.mxu1 %v1475_v37 }
 0x1ea   :  { %477 = vrot.lane.b32.xlu1 %v1469_v34, %s1524_s3 }
 0x1eb   :  { %v1477_v38 = vpop.eup %1476 }
 0x1ec   :  { %v1479_v7 = vpop.eup %1478  ;;  %1383 = vmatprep.mubr.f32.mxu1 %v1477_v38 }
 0x1ed   :  { %1384 = vmatmul.mubr.f32.gmra.mxu1 %v1479_v7 }
 0x1ee   :  { %483 = vrot.lane.b32.xlu1 %v1475_v37, %s1524_s3  ;;  %1430 = vmatprep.mubr.msk.f32.mxu1 %vm158_vm0, %v1730_v46 }
 0x1f2   :  { %481 = vrot.lane.b32.xlu1 %v1473_v36, %s1524_s3 }
 0x1f6   :  { %487 = vrot.lane.b32.xlu1 %v1479_v7, %s1524_s3 }
 0x1fa   :  { %485 = vrot.lane.b32.xlu1 %v1477_v38, %s1524_s3 }
 0x250   :  { %v476_v39 = vpop.permute.xlu1 %475 }
 0x251   :  { %v499_v40 = vsel %vm497_vm1, %v1451_v13, %v476_v39 }
 0x252   :  { %507 = vst.msk [vmem:[#allocation2 + $0x8] sm:$0xff] %vm158_vm0, %v499_v40 }
 0x254   :  { %v474_v41 = vpop.permute.xlu1 %473 }
 0x255   :  { %v498_v42 = vsel %vm497_vm1, %v1817_v10, %v474_v41 }
 0x256   :  { %506 = vst.msk [vmem:[#allocation2] sm:$0xff] %vm158_vm0, %v498_v42 }
 0x258   :  { %v480_v43 = vpop.permute.xlu1 %479 }
 0x259   :  { %v501_v44 = vsel %vm497_vm1, %v1455_v19, %v480_v43 }
 0x25a   :  { %509 = vst.msk [vmem:[#allocation2 + $0x18] sm:$0xff] %vm158_vm0, %v501_v44 }
 0x25c   :  { %v478_v45 = vpop.permute.xlu1 %477 }
 0x25d   :  { %v500_v46 = vsel %vm497_vm1, %v1820_v16, %v478_v45 }
 0x25e   :  { %508 = vst.msk [vmem:[#allocation2 + $0x10] sm:$0xff] %vm158_vm0, %v500_v46 }
 0x260   :  { %v484_v47 = vpop.permute.xlu1 %483 }
 0x261   :  { %v503_v55 = vsel %vm497_vm1, %v1459_v25, %v484_v47 }
 0x262   :  { %511 = vst.msk [vmem:[#allocation2 + $0x28] sm:$0xff] %vm158_vm0, %v503_v55 }
 0x264   :  { %v482_v56 = vpop.permute.xlu1 %481 }
 0x265   :  { %v502_v57 = vsel %vm497_vm1, %v1457_v22, %v482_v56 }
 0x266   :  { %510 = vst.msk [vmem:[#allocation2 + $0x20] sm:$0xff] %vm158_vm0, %v502_v57 }
 0x268   :  { %v488_v58 = vpop.permute.xlu1 %487 }
 0x269   :  { %v505_v59 = vsel %vm497_vm1, %v1463_v30, %v488_v58 }
 0x26a   :  { %513 = vst.msk [vmem:[#allocation2 + $0x38] sm:$0xff] %vm158_vm0, %v505_v59 }
 0x26c   :  { %v486_v60 = vpop.permute.xlu1 %485 }
 0x26d   :  { %v504_v61 = vsel %vm497_vm1, %v1461_v28, %v486_v60 }
 0x26e   :  { %512 = vst.msk [vmem:[#allocation2 + $0x30] sm:$0xff] %vm158_vm0, %v504_v61 }
 0x291   :  { %v1332_v62 = vpop.f32.mrf.mxu0 }
 0x293   :  { %v596_v63 = vpop.f32.mrf.mxu0 }
 0x295   :  { %v1335_v0 = vpop.f32.mrf.mxu0 }
 0x297   :  { %v606_v1 = vpop.f32.mrf.mxu0 }
 0x299   :  { %v1338_v2 = vpop.f32.mrf.mxu0 }
 0x29b   :  { %v616_v3 = vpop.f32.mrf.mxu0 }
 0x29d   :  { %v1341_v4 = vpop.f32.mrf.mxu0 }
 0x29e   :  { %1386 = vmatprep.subr.mxu0 %v1341_v4 }
 0x29f   :  { %v626_v5 = vpop.f32.mrf.mxu0  ;;  %1387 = vmatpush3.msra.mxu0 %v1341_v4 }
 0x2a0   :  { %1388 = vmatprep.subr.mxu0 %v626_v5 }
 0x2a1   :  { %v1376_v6 = vpop.f32.mrf.mxu1  ;;  %1389 = vmatpush3.msra.mxu0 %v626_v5 }
 0x2a2   :  { %1390 = vmatprep.subr.mxu0 %v1338_v2 }
 0x2a3   :  { %v701_v8 = vpop.f32.mrf.mxu1  ;;  %1391 = vmatpush3.msra.mxu0 %v1338_v2 }
 0x2a4   :  { %1392 = vmatprep.subr.mxu0 %v616_v3 }
 0x2a5   :  { %v1379_v10 = vpop.f32.mrf.mxu1  ;;  %1393 = vmatpush3.msra.mxu0 %v616_v3 }
 0x2a6   :  { %1394 = vmatprep.subr.mxu0 %v1335_v0 }
 0x2a7   :  { %v711_v11 = vpop.f32.mrf.mxu1  ;;  %1395 = vmatpush3.msra.mxu0 %v1335_v0 }
 0x2a8   :  { %1396 = vmatprep.subr.mxu0 %v606_v1 }
 0x2a9   :  { %v1382_v13 = vpop.f32.mrf.mxu1  ;;  %1397 = vmatpush3.msra.mxu0 %v606_v1 }
 0x2aa   :  { %1398 = vmatprep.subr.mxu0 %v1332_v62 }
 0x2ab   :  { %v721_v14 = vpop.f32.mrf.mxu1  ;;  %1399 = vmatpush3.msra.mxu0 %v1332_v62 }
 0x2ac   :  { %1400 = vmatprep.subr.mxu0 %v596_v63 }
 0x2ad   :  { %v1385_v16 = vpop.f32.mrf.mxu1  ;;  %1401 = vmatpush3.msra.mxu0 %v596_v63 }
 0x2ae   :  { %1414 = vmatprep.subr.mxu1 %v1385_v16  ;;  %1403 = vmatmul.mubr.msk.f32.vlgmr.msra.gmra.mxu0 %vm158_vm0, %v1592_v9 }
 0x2af   :  { %v731_v17 = vpop.f32.mrf.mxu1  ;;  %1415 = vmatpush3.msra.mxu1 %v1385_v16  ;;  %1405 = vmatprep.mubr.msk.f32.mxu0 %vm158_vm0, %v1604_v12 }
 0x2b0   :  { %1416 = vmatprep.subr.mxu1 %v731_v17 }
 0x2b1   :  { %1417 = vmatpush3.msra.mxu1 %v731_v17 }
 0x2b2   :  { %1418 = vmatprep.subr.mxu1 %v1382_v13  ;;  %1406 = vmatmul.mubr.msk.f32.gmra.mxu0 %vm158_vm0, %v1616_v15 }
 0x2b3   :  { %1419 = vmatpush3.msra.mxu1 %v1382_v13  ;;  %1408 = vmatprep.mubr.msk.f32.mxu0 %vm158_vm0, %v1628_v18 }
 0x2b4   :  { %1420 = vmatprep.subr.mxu1 %v721_v14 }
 0x2b5   :  { %1421 = vmatpush3.msra.mxu1 %v721_v14 }
 0x2b6   :  { %1422 = vmatprep.subr.mxu1 %v1379_v10  ;;  %1409 = vmatmul.mubr.msk.f32.gmra.mxu0 %vm158_vm0, %v1640_v21 }
 0x2b7   :  { %1423 = vmatpush3.msra.mxu1 %v1379_v10  ;;  %1411 = vmatprep.mubr.msk.f32.mxu0 %vm158_vm0, %v1652_v24 }
 0x2b8   :  { %1424 = vmatprep.subr.mxu1 %v711_v11 }
 0x2b9   :  { %1425 = vmatpush3.msra.mxu1 %v711_v11 }
 0x2ba   :  { %1426 = vmatprep.subr.mxu1 %v1376_v6  ;;  %1412 = vmatmul.mubr.msk.f32.gmra.mxu0 %vm158_vm0, %v1664_v27 }
 0x2bb   :  { %1427 = vmatpush3.msra.mxu1 %v1376_v6 }
 0x2bc   :  { %1428 = vmatprep.subr.mxu1 %v701_v8 }
 0x2bd   :  { %1429 = vmatpush3.msra.mxu1 %v701_v8 }
 0x2be   :  { %1431 = vmatmul.mubr.msk.f32.vlgmr.msra.gmra.mxu1 %vm158_vm0, %v1732_v48 }
 0x2bf   :  { %1433 = vmatprep.mubr.msk.f32.mxu1 %vm158_vm0, %v1734_v49 }
 0x2c2   :  { %1434 = vmatmul.mubr.msk.f32.gmra.mxu1 %vm158_vm0, %v1740_v50 }
 0x2c3   :  { %1436 = vmatprep.mubr.msk.f32.mxu1 %vm158_vm0, %v1746_v51 }
 0x2c6   :  { %1437 = vmatmul.mubr.msk.f32.gmra.mxu1 %vm158_vm0, %v1756_v52 }
 0x2c7   :  { %1439 = vmatprep.mubr.msk.f32.mxu1 %vm158_vm0, %v1765_v53 }
 0x2ca   :  { %1440 = vmatmul.mubr.msk.f32.gmra.mxu1 %vm158_vm0, %v1781_v54 }
 0x37e   :  { %v1432_v9 = vpop.f32.mrf.mxu1 }
 0x37f   :  { %960 = vrot.lane.b32.xlu1 %v1432_v9, %s1524_s3 }
 0x380   :  { %v911_v12 = vpop.f32.mrf.mxu1 }
 0x381   :  { %958 = vrot.lane.b32.xlu0 %v911_v12, %s1524_s3 }
 0x382   :  { %v1435_v15 = vpop.f32.mrf.mxu1 }
 0x383   :  { %964 = vrot.lane.b32.xlu1 %v1435_v15, %s1524_s3 }
 0x384   :  { %v921_v18 = vpop.f32.mrf.mxu1 }
 0x386   :  { %v1438_v21 = vpop.f32.mrf.mxu1 }
 0x387   :  { %962 = vrot.lane.b32.xlu1 %v921_v18, %s1524_s3 }
 0x388   :  { %v931_v24 = vpop.f32.mrf.mxu1 }
 0x38b   :  { %968 = vrot.lane.b32.xlu1 %v1438_v21, %s1524_s3 }
 0x38c   :  { %1491 = shalt.err (!%p1488_p4)
}
 0x38d   :  { %s1526_s11 = smov 128   ;;  %s1527_s12 = smov 8   ;;  %v1441_v27 = vpop.f32.mrf.mxu1  ;;  %v1404_v49 = vpop.f32.mrf.mxu0 }
 0x38e   :  { %1009 = dma.vmem_to_hbm [thread:$0]  %s1004_s9, 1024, %s1921_s4, [#allocation3], %s1526_s11, %s1526_s11, %s1527_s12  }
 0x38f   :  { %966 = vrot.lane.b32.xlu1 %v931_v24, %s1524_s3  ;;  %v941_v48 = vpop.f32.mrf.mxu1  ;;  %v806_v50 = vpop.f32.mrf.mxu0  ;;  %s1528_s4 = smov [#allocation4]  }
 0x390   :  { %s1015_s15 = sshll.u32 %s1528_s4, 4  ;;  %s1016_s15 = int_to_ptr.vmem [resolvable:$true] %s1015_s15 }
 0x391   :  { %v1407_v54 = vpop.f32.mrf.mxu0  ;;  %s1500_s16 = scalar_lea.vmem %s1016_s15, 1024  ;;  %p1505_p6 = scmp.lt.s32.totalorder %s1016_s15, %s1016_s15 }
 0x392   :  { %p1501_p5 = scmp.ne.s32.totalorder %s1016_s15, %s1500_s16  ;;  %p1506_p7 = scmp.lt.s32.totalorder %s1500_s16, %s1500_s16 }
 0x393   :  { %970 = vrot.lane.b32.xlu1 %v941_v48, %s1524_s3  ;;  %v816_v23 = vpop.f32.mrf.mxu0 }
 0x394   :  { %p1507_p8 = por %p1506_p7, %p1505_p6 }
 0x395   :  { %v1410_v26 = vpop.f32.mrf.mxu0 }
 0x396   :  { %p1508_p9 = pnand %p1507_p8, %p1501_p5 }
 0x397   :  { %972 = vrot.lane.b32.xlu1 %v1441_v27, %s1524_s3  ;;  %v826_v29 = vpop.f32.mrf.mxu0 }
 0x399   :  { %v1413_v32 = vpop.f32.mrf.mxu0 }
 0x39b   :  { %v836_v35 = vpop.f32.mrf.mxu0 }
 0x3f1   :  { %v961_v51 = vpop.permute.xlu1 %960 }
 0x3f2   :  { %v983_v52 = vsel %vm497_vm1, %v1404_v49, %v961_v51 }
 0x3f3   :  { %991 = vst.msk [vmem:[#allocation4 + $0x8] sm:$0xff] %vm158_vm0, %v983_v52  ;;  %v959_v53 = vpop.permute.xlu0 %958 }
 0x3f4   :  { %v982_v19 = vsel %vm497_vm1, %v806_v50, %v959_v53 }
 0x3f5   :  { %990 = vst.msk [vmem:[#allocation4] sm:$0xff] %vm158_vm0, %v982_v19  ;;  %v965_v20 = vpop.permute.xlu1 %964 }
 0x3f6   :  { %v985_v22 = vsel %vm497_vm1, %v1407_v54, %v965_v20 }
 0x3f7   :  { %993 = vst.msk [vmem:[#allocation4 + $0x18] sm:$0xff] %vm158_vm0, %v985_v22 }
 0x3f9   :  { %v963_v25 = vpop.permute.xlu1 %962 }
 0x3fa   :  { %v984_v28 = vsel %vm497_vm1, %v816_v23, %v963_v25 }
 0x3fb   :  { %992 = vst.msk [vmem:[#allocation4 + $0x10] sm:$0xff] %vm158_vm0, %v984_v28 }
 0x3fd   :  { %v969_v30 = vpop.permute.xlu1 %968 }
 0x3fe   :  { %v987_v31 = vsel %vm497_vm1, %v1410_v26, %v969_v30 }
 0x3ff   :  { %995 = vst.msk [vmem:[#allocation4 + $0x28] sm:$0xff] %vm158_vm0, %v987_v31 }
 0x401   :  { %v967_v33 = vpop.permute.xlu1 %966 }
 0x402   :  { %v986_v34 = vsel %vm497_vm1, %v826_v29, %v967_v33 }
 0x403   :  { %994 = vst.msk [vmem:[#allocation4 + $0x20] sm:$0xff] %vm158_vm0, %v986_v34 }
 0x405   :  { %v971_v36 = vpop.permute.xlu1 %970 }
 0x406   :  { %v988_v37 = vsel %vm497_vm1, %v836_v35, %v971_v36 }
 0x407   :  { %996 = vst.msk [vmem:[#allocation4 + $0x30] sm:$0xff] %vm158_vm0, %v988_v37 }
 0x409   :  { %v973_v38 = vpop.permute.xlu1 %972 }
 0x40a   :  { %v989_v7 = vsel %vm497_vm1, %v1413_v32, %v973_v38 }
 0x40b   :  { %997 = vst.msk [vmem:[#allocation4 + $0x38] sm:$0xff] %vm158_vm0, %v989_v7 }
 0x40c   :  { %1511 = shalt.err (!%p1508_p9)
}
 0x40d   :  { %1021 = dma.vmem_to_hbm [thread:$0]  %s1016_s15, 1024, %s1922_s5, [#allocation5], %s1526_s11, %s1526_s11, %s1527_s12  }
 0x40e   :  { %1520 = dma.done.wait [#allocation3], 1024  }
 0x40f   :  { %1521 = vsyncadd [#allocation3], 4294966272 }
 0x410   :  { %1522 = dma.done.wait [#allocation5], 1024  }
 0x411   :  { %1523 = vsyncadd [#allocation5], 4294966272 }
 0x412   :  { %1028 = vsyncpa [#allocation3], 1 }
 0x413   :  { %1029 = vsyncpa [#allocation5], 1 }

</bundles_post_ra>
